<compile_context>
chip_gen: v5e
topology: v5e:2x2
jax: 0.10.0
libtpu: 0.0.40
codegen_flags: <defaults>
</compile_context>

<pallas_src>
import functools

import jax
import jax.numpy as jnp
from jax import lax
from jax.experimental import pallas as pl
from jax.experimental.pallas import tpu as pltpu


def _sdpa_kernel(*refs, inv_temperature, use_mask):
    if use_mask:
        q_ref, k_ref, v_ref, mask_ref, out_ref, attn_ref = refs
    else:
        q_ref, k_ref, v_ref, out_ref, attn_ref = refs
        mask_ref = None

    # Native-dtype loads: the MXU consumes bf16/f32 directly with f32
    # accumulation via preferred_element_type — no pre-upcast.
    q = q_ref[...]   # (Bt, Tq, Dk)
    k = k_ref[...]   # (Bt, Lk, Dk)
    v = v_ref[...]   # (Bt, Lk, Dv)

    # Fold 1/temperature into q (Tq*Dk elements instead of Tq*Lk scores).
    q = q * jnp.asarray(inv_temperature, dtype=q.dtype)

    # scores = q @ k^T, batched over Bt, contracting the last dims of both
    # operands (NT dot_general — no XLU transpose of k).
    scores = lax.dot_general(
        q, k,
        dimension_numbers=(((2,), (2,)), ((0,), (0,))),
        preferred_element_type=jnp.float32,
    )  # (Bt, Tq, Lk) f32

    if use_mask:
        m = mask_ref[...]
        # Same semantics as torch.masked_fill(mask, -inf) before softmax.
        scores = jnp.where(m != 0, -jnp.inf, scores)

    # Softmax over the key axis (dim=2 in the PyTorch module), in f32.
    row_max = jnp.max(scores, axis=-1, keepdims=True)
    exps = jnp.exp(scores - row_max)
    denom = jnp.sum(exps, axis=-1, keepdims=True)
    # Reciprocal is only per-row (Bt*Tq values); exact keeps the softmax
    # numerically tight vs. the reference at negligible cost.
    attn = exps * pl.reciprocal(denom, approx=False)   # (Bt, Tq, Lk)

    # output = attn @ v — cast attn to v's dtype so bf16 runs the MXU at full
    # rate; accumulation stays f32.
    out = lax.dot_general(
        attn.astype(v.dtype), v,
        dimension_numbers=(((2,), (1,)), ((0,), (0,))),
        preferred_element_type=jnp.float32,
    )  # (Bt, Tq, Dv)

    attn_ref[...] = attn.astype(attn_ref.dtype)
    out_ref[...] = out.astype(out_ref.dtype)


def scaled_dot_product_attention(q, k, v, temperature, mask=None,
                                 *, block_b=None, block_q=None):
    """Pallas implementation of ScaledDotProductAttention.forward (eval mode).

    Returns (output, attn), matching the PyTorch module.
    """
    B, Lq, Dk = q.shape
    Bk, Lk, Dk2 = k.shape
    Bv, Lkv, Dv = v.shape
    assert Dk == Dk2 and Bk == B and Bv == B and Lkv == Lk

    use_mask = mask is not None

    # Block several batches / query rows per grid step to amortize per-step
    # overhead. block_q must be a multiple of 8 or the full Lq; defaults obey.
    if block_b is None:
        block_b = B if B <= 16 else 8
    if block_q is None:
        block_q = Lq if Lq <= 256 else 256
    block_b = min(block_b, B)
    block_q = min(block_q, Lq)

    grid = (pl.cdiv(B, block_b), pl.cdiv(Lq, block_q))

    in_specs = [
        pl.BlockSpec((block_b, block_q, Dk), lambda b, i: (b, i, 0)),   # q
        pl.BlockSpec((block_b, Lk, Dk), lambda b, i: (b, 0, 0)),        # k
        pl.BlockSpec((block_b, Lk, Dv), lambda b, i: (b, 0, 0)),        # v
    ]
    inputs = [q, k, v]
    if use_mask:
        in_specs.append(
            pl.BlockSpec((block_b, block_q, Lk), lambda b, i: (b, i, 0)))
        inputs.append(mask.astype(jnp.int32))

    out_specs = [
        pl.BlockSpec((block_b, block_q, Dv), lambda b, i: (b, i, 0)),   # out
        pl.BlockSpec((block_b, block_q, Lk), lambda b, i: (b, i, 0)),   # attn
    ]
    out_shape = (
        jax.ShapeDtypeStruct((B, Lq, Dv), q.dtype),   # output
        jax.ShapeDtypeStruct((B, Lq, Lk), q.dtype),   # attn (input dtype)
    )

    kernel = functools.partial(
        _sdpa_kernel,
        inv_temperature=1.0 / float(temperature),
        use_mask=use_mask,
    )

    fn = pl.pallas_call(
        kernel,
        out_shape=out_shape,
        grid_spec=pltpu.PrefetchScalarGridSpec(
            num_scalar_prefetch=0,
            grid=grid,
            in_specs=in_specs,
            out_specs=out_specs,
        ),
        compiler_params=pltpu.CompilerParams(
            dimension_semantics=("parallel", "parallel"),
        ),
    )
    return fn(*inputs)


def _reference(q, k, v, temperature, mask=None):
    attn = jnp.einsum("bqd,bkd->bqk", q, k) / temperature
    if mask is not None:
        attn = jnp.where(mask, -jnp.inf, attn)
    attn = jax.nn.softmax(attn, axis=2)
    out = jnp.einsum("bqk,bkd->bqd", attn, v)
    return out, attn


if __name__ == "__main__":
    key = jax.random.PRNGKey(0)
    B, Lq, Lk, Dk, Dv = 2, 8, 8, 32, 32
    temperature = float(jnp.sqrt(jnp.float32(Dk)))

    kq, kk, kv, km = jax.random.split(key, 4)
    q = jax.random.normal(kq, (B, Lq, Dk), dtype=jnp.float32)
    k = jax.random.normal(kk, (B, Lk, Dk), dtype=jnp.float32)
    v = jax.random.normal(kv, (B, Lk, Dv), dtype=jnp.float32)
    # Mask some positions (True == masked), but never a full row.
    mask = jax.random.bernoulli(km, p=0.2, shape=(B, Lq, Lk))
    mask = mask.at[:, :, 0].set(False)

    out, attn = scaled_dot_product_attention(q, k, v, temperature, mask=mask)
    out = jax.block_until_ready(out)
    attn = jax.block_until_ready(attn)

    ref_out, ref_attn = _reference(q, k, v, temperature, mask=mask)
    assert jnp.allclose(out, ref_out, atol=2e-5, rtol=2e-5), "output mismatch"
    assert jnp.allclose(attn, ref_attn, atol=2e-5, rtol=2e-5), "attn mismatch"

    # Also exercise the no-mask path (no dummy mask is DMA'd in this path).
    out2, attn2 = scaled_dot_product_attention(q, k, v, temperature, mask=None)
    out2 = jax.block_until_ready(out2)
    attn2 = jax.block_until_ready(attn2)
    ref_out2, ref_attn2 = _reference(q, k, v, temperature, mask=None)
    assert jnp.allclose(out2, ref_out2, atol=2e-5, rtol=2e-5)
    assert jnp.allclose(attn2, ref_attn2, atol=2e-5, rtol=2e-5)

    print("KERNEL_OK")
</pallas_src>

<mosaic_0001>
module attributes {stable_mosaic.version = 11 : i64} {
  func.func @_sdpa_kernel(%arg0: i32, %arg1: i32, %arg2: memref<2x8x32xf32, #tpu.memory_space<vmem>>, %arg3: memref<2x8x32xf32, #tpu.memory_space<vmem>>, %arg4: memref<2x8x32xf32, #tpu.memory_space<vmem>>, %arg5: memref<2x8x8xi32, #tpu.memory_space<vmem>>, %arg6: memref<2x8x32xf32, #tpu.memory_space<vmem>>, %arg7: memref<2x8x8xf32, #tpu.memory_space<vmem>>) attributes {dimension_semantics = [#tpu.dimension_semantics<parallel>, #tpu.dimension_semantics<parallel>], iteration_bounds = array<i64: 1, 1>, scalar_prefetch = 0 : i64, scratch_operands = 0 : i64, tpu.core_type = #tpu.core_type<tc>, window_params = [{transform_indices = @transform_0, window_bounds = array<i64: 2, 8, 32>}, {transform_indices = @transform_1, window_bounds = array<i64: 2, 8, 32>}, {transform_indices = @transform_2, window_bounds = array<i64: 2, 8, 32>}, {transform_indices = @transform_3, window_bounds = array<i64: 2, 8, 8>}, {transform_indices = @transform_4, window_bounds = array<i64: 2, 8, 32>}, {transform_indices = @transform_5, window_bounds = array<i64: 2, 8, 8>}]} {
    %c0 = arith.constant 0 : index
    %c0_0 = arith.constant 0 : index
    %c0_1 = arith.constant 0 : index
    %0 = vector.load %arg2[%c0, %c0_0, %c0_1] : memref<2x8x32xf32, #tpu.memory_space<vmem>>, vector<2x8x32xf32>
    %c0_2 = arith.constant 0 : index
    %c0_3 = arith.constant 0 : index
    %c0_4 = arith.constant 0 : index
    %1 = vector.load %arg3[%c0_2, %c0_3, %c0_4] : memref<2x8x32xf32, #tpu.memory_space<vmem>>, vector<2x8x32xf32>
    %c0_5 = arith.constant 0 : index
    %c0_6 = arith.constant 0 : index
    %c0_7 = arith.constant 0 : index
    %2 = vector.load %arg4[%c0_5, %c0_6, %c0_7] : memref<2x8x32xf32, #tpu.memory_space<vmem>>, vector<2x8x32xf32>
    %cst = arith.constant 0.176776692 : f32
    %3 = vector.broadcast %cst : f32 to vector<2x8x32xf32>
    %4 = arith.mulf %0, %3 : vector<2x8x32xf32>
    %cst_8 = arith.constant dense<0.000000e+00> : vector<2x8x8xf32>
    %5 = tpu.matmul %4, %1, %cst_8 {dimension_numbers = #tpu.dot_dimension_numbers<[2], [2], [1], [1], [0, 0, 0, 1, 1, 1], [0], [0]>} : vector<2x8x32xf32>, vector<2x8x32xf32>, vector<2x8x8xf32> -> vector<2x8x8xf32>
    %c0_9 = arith.constant 0 : index
    %c0_10 = arith.constant 0 : index
    %c0_11 = arith.constant 0 : index
    %6 = vector.load %arg5[%c0_9, %c0_10, %c0_11] : memref<2x8x8xi32, #tpu.memory_space<vmem>>, vector<2x8x8xi32>
    %c0_i32 = arith.constant 0 : i32
    %7 = vector.broadcast %c0_i32 : i32 to vector<2x8x8xi32>
    %8 = arith.cmpi ne, %6, %7 : vector<2x8x8xi32>
    %cst_12 = arith.constant 0xFF800000 : f32
    %9 = vector.broadcast %cst_12 : f32 to vector<2x8x8xf32>
    %10 = arith.select %8, %9, %5 : vector<2x8x8xi1>, vector<2x8x8xf32>
    %cst_13 = arith.constant dense<0xFF800000> : vector<2x8xf32>
    %11 = vector.multi_reduction <maximumf>, %10, %cst_13 [2] : vector<2x8x8xf32> to vector<2x8xf32>
    %12 = vector.shape_cast %11 : vector<2x8xf32> to vector<2x8x1xf32>
    %13 = vector.broadcast %12 : vector<2x8x1xf32> to vector<2x8x8xf32>
    %14 = arith.subf %10, %13 : vector<2x8x8xf32>
    %15 = math.exp %14 : vector<2x8x8xf32>
    %cst_14 = arith.constant dense<0.000000e+00> : vector<2x8xf32>
    %16 = vector.multi_reduction <add>, %15, %cst_14 [2] : vector<2x8x8xf32> to vector<2x8xf32>
    %17 = vector.shape_cast %16 : vector<2x8xf32> to vector<2x8x1xf32>
    %18 = tpu.reciprocal %17 : vector<2x8x1xf32> -> vector<2x8x1xf32>
    %19 = vector.broadcast %18 : vector<2x8x1xf32> to vector<2x8x8xf32>
    %20 = arith.mulf %15, %19 : vector<2x8x8xf32>
    %cst_15 = arith.constant dense<0.000000e+00> : vector<2x8x32xf32>
    %21 = tpu.matmul %20, %2, %cst_15 {dimension_numbers = #tpu.dot_dimension_numbers<[2], [1], [1], [2], [0, 0, 0, 1, 1, 2], [0], [0]>} : vector<2x8x8xf32>, vector<2x8x32xf32>, vector<2x8x32xf32> -> vector<2x8x32xf32>
    %c0_16 = arith.constant 0 : index
    %c0_17 = arith.constant 0 : index
    %c0_18 = arith.constant 0 : index
    %22 = vector.load %arg7[%c0_16, %c0_17, %c0_18] : memref<2x8x8xf32, #tpu.memory_space<vmem>>, vector<2x8x8xf32>
    tpu.vector_store %arg7[%c0_16, %c0_17, %c0_18], %20 {strides = array<i32>} : memref<2x8x8xf32, #tpu.memory_space<vmem>>, vector<2x8x8xf32>,
    %c0_19 = arith.constant 0 : index
    %c0_20 = arith.constant 0 : index
    %c0_21 = arith.constant 0 : index
    %23 = vector.load %arg6[%c0_19, %c0_20, %c0_21] : memref<2x8x32xf32, #tpu.memory_space<vmem>>, vector<2x8x32xf32>
    tpu.vector_store %arg6[%c0_19, %c0_20, %c0_21], %21 {strides = array<i32>} : memref<2x8x32xf32, #tpu.memory_space<vmem>>, vector<2x8x32xf32>,
    return
  }
  func.func @transform_0(%arg0: i32, %arg1: i32) -> (i32, i32, i32) {
    %c0_i32 = arith.constant 0 : i32
    %c0_i32_0 = arith.constant 0 : i32
    return %arg0, %arg1, %c0_i32 : i32, i32, i32
  }
  func.func @transform_1(%arg0: i32, %arg1: i32) -> (i32, i32, i32) {
    %c0_i32 = arith.constant 0 : i32
    %c0_i32_0 = arith.constant 0 : i32
    %c0_i32_1 = arith.constant 0 : i32
    return %arg0, %c0_i32, %c0_i32_0 : i32, i32, i32
  }
  func.func @transform_2(%arg0: i32, %arg1: i32) -> (i32, i32, i32) {
    %c0_i32 = arith.constant 0 : i32
    %c0_i32_0 = arith.constant 0 : i32
    %c0_i32_1 = arith.constant 0 : i32
    return %arg0, %c0_i32, %c0_i32_0 : i32, i32, i32
  }
  func.func @transform_3(%arg0: i32, %arg1: i32) -> (i32, i32, i32) {
    %c0_i32 = arith.constant 0 : i32
    %c0_i32_0 = arith.constant 0 : i32
    return %arg0, %arg1, %c0_i32 : i32, i32, i32
  }
  func.func @transform_4(%arg0: i32, %arg1: i32) -> (i32, i32, i32) {
    %c0_i32 = arith.constant 0 : i32
    %c0_i32_0 = arith.constant 0 : i32
    return %arg0, %arg1, %c0_i32 : i32, i32, i32
  }
  func.func @transform_5(%arg0: i32, %arg1: i32) -> (i32, i32, i32) {
    %c0_i32 = arith.constant 0 : i32
    %c0_i32_0 = arith.constant 0 : i32
    return %arg0, %arg1, %c0_i32 : i32, i32, i32
  }
}

</mosaic_0001>

<bundles_post_ra>
// kernel: tpu_custom_call.1
= control target key start
LH: loop header
LB: loop body
LE: loop exit
PB: predicated region body
PF: predicated region fallthrough
CT: control target
= control target key end

     0   :  { %11 = vsyncpa [#allocation3], 0  ;;  %s553_s0 = inlined_call_operand.hbm [shape: f32[2,8,32], index: 0, kind: input, shape index: {}]   ;;  %s554_s1 = inlined_call_operand.hbm [shape: f32[2,8,32], index: 1, kind: input, shape index: {}]   ;;  %s555_s2 = inlined_call_operand.hbm [shape: f32[2,8,32], index: 2, kind: input, shape index: {}]   ;;  %s556_s3 = inlined_call_operand.hbm [shape: s32[2,8,8], index: 3, kind: input, shape index: {}]   ;;  %s557_s4 = inlined_call_operand.hbm [shape: f32[2,8,32], index: 4, kind: output, shape index: {0}]   ;;  %s558_s5 = inlined_call_operand.hbm [shape: f32[2,8,8], index: 5, kind: output, shape index: {1}]  }
   0x1   :  { %12 = vsyncpa [#allocation6], 0 }
   0x2   :  { %13 = vsyncpa [#allocation9], 0 }
   0x3   :  { %14 = vsyncpa [#allocation4], 0 }
   0x4   :  { %15 = vsyncpa [#allocation12], 0  ;;  %s33_s20 = sshll.u32 %s554_s1, 4  ;;  %s465_s21 = smov [#allocation5]   ;;  %s34_s20 = int_to_ptr.hbm [resolvable:$true] %s33_s20 }
   0x5   :  { %s35_s22 = sshll.u32 %s465_s21, 4  ;;  %s20_s25 = sshll.u32 %s553_s0, 4  ;;  %s36_s22 = int_to_ptr.vmem [resolvable:$true] %s35_s22  ;;  %s21_s25 = int_to_ptr.hbm [resolvable:$true] %s20_s25 }
   0x6   :  { %s466_s26 = smov 128   ;;  %s467_s27 = smov 8  }
   0x7   :  { %41 = dma.hbm_to_vmem [thread:$0]  %s34_s20, 256, %s36_s22, [#allocation6], %s466_s26, %s466_s26, %s467_s27  }
   0x8   :  { %s468_s28 = smov [#allocation2]   ;;  %s46_s1 = sshll.u32 %s555_s2, 4  ;;  %s47_s1 = int_to_ptr.hbm [resolvable:$true] %s46_s1 }
   0x9   :  { %s22_s29 = sshll.u32 %s468_s28, 4  ;;  %s59_s8 = sshll.u32 %s556_s3, 4  ;;  %s23_s29 = int_to_ptr.vmem [resolvable:$true] %s22_s29  ;;  %s60_s8 = int_to_ptr.hbm [resolvable:$true] %s59_s8 }
   0xa   :  { %28 = dma.hbm_to_vmem [thread:$0]  %s21_s25, 256, %s23_s29, [#allocation3], %s466_s26, %s466_s26, %s467_s27  }
   0xb   :  { %s469_s9 = smov [#allocation7]   ;;  %s470_s11 = smov [#allocation8]  }
   0xc   :  { %s48_s10 = sshll.u32 %s469_s9, 4  ;;  %s61_s2 = sshll.u32 %s470_s11, 4  ;;  %s49_s10 = int_to_ptr.vmem [resolvable:$true] %s48_s10  ;;  %s62_s2 = int_to_ptr.vmem [resolvable:$true] %s61_s2 }
   0xd   :  { %54 = dma.hbm_to_vmem [thread:$0]  %s47_s1, 256, %s49_s10, [#allocation6], %s466_s26, %s466_s26, %s467_s27  }
   0xe   :  { %67 = dma.hbm_to_vmem [thread:$0]  %s60_s8, 256, %s62_s2, [#allocation9], %s466_s26, %s466_s26, %s467_s27  }
   0xf   :  { %455 = dma.done.wait [#allocation3], 256  }
  0x10   :  { %456 = vsyncadd [#allocation3], 4294967040 }
  0x11   :  { %457 = dma.done.wait [#allocation6], 512  }
  0x12   :  { %458 = vsyncadd [#allocation6], 4294966784 }
  0x13   :  { %459 = dma.done.wait [#allocation9], 256  }
  0x14   :  { %460 = vsyncadd [#allocation9], 4294967040  ;;  %vm92_vm0 = vcmask 261120   ;;  %v86_v0 = vld [vmem:[#allocation5] sm:$0xff]  ;;  %v84_v1 = vld [vmem:[#allocation2] sm:$0xff]  ;;  %vm151_vm2 = vcmask 64512  }
  0x15   :  { %v87_v2 = vld [vmem:[#allocation5 + $0x8] sm:$0xff]  ;;  %289 = vmatpush.xpose.msk.msra.mxu0 %vm92_vm0, %v86_v0  ;;  %v90_v3 = vmul.f32 0.17677669, %v84_v1  ;;  %v85_v4 = vld [vmem:[#allocation2 + $0x8] sm:$0xff]  ;;  %v145_v6 = vld [vmem:[#allocation8] sm:$0xff]  ;;  %s471_s3 = smov [#allocation11]  }
  0x16   :  { %291 = vmatpush.xpose.msk.msra.mxu1 %vm92_vm0, %v87_v2  ;;  %v91_v5 = vmul.f32 0.17677669, %v85_v4  ;;  %vm147_vm1 = vcmp.ne.s32.totalorder %v145_v6, 0  ;;  %v146_v7 = vld [vmem:[#allocation8 + $0x8] sm:$0xff]  ;;  %v88_v24 = vld [vmem:[#allocation7] sm:$0xff]  ;;  %v89_v25 = vld [vmem:[#allocation7 + $0x8] sm:$0xff] }
  0x17   :  { %vm148_vm3 = vcmp.ne.s32.totalorder %v146_v7, 0  ;;  %218 = vmatpush.msra.mxu2 %v88_v24  ;;  %241 = vmatpush.msra.mxu3 %v89_v25  ;;  %s267_s12 = sshll.u32 %s471_s3, 4  ;;  %s269_s15 = sshll.u32 %s558_s5, 4  ;;  %s268_s12 = int_to_ptr.vmem [resolvable:$true] %s267_s12  ;;  %s270_s15 = int_to_ptr.hbm [resolvable:$true] %s269_s15 }
  0x18   :  { %290 = vmatmul.msk.f32.vlgmr.msra.gmra.mxu0 %vm92_vm0, %v90_v3  ;;  %s472_s16 = smov [#allocation10]   ;;  %s256_s20 = sshll.u32 %s557_s4, 4  ;;  %s257_s20 = int_to_ptr.hbm [resolvable:$true] %s256_s20 }
  0x19   :  { %292 = vmatmul.msk.f32.vlgmr.msra.gmra.mxu1 %vm92_vm0, %v91_v5  ;;  %s254_s17 = sshll.u32 %s472_s16, 4  ;;  %s255_s17 = int_to_ptr.vmem [resolvable:$true] %s254_s17 }
  0x95   :  { %v116_v8 = vpop.f32.mrf.mxu0 }
  0x96   :  { %v149_v9 = vsel %vm147_vm1, -inf, %v116_v8  ;;  %v142_v11 = vpop.f32.mrf.mxu1 }
  0x97   :  { %v152_v10 = vsel %vm151_vm2, %v149_v9, -inf  ;;  %v150_v12 = vsel %vm148_vm3, -inf, %v142_v11 }
  0x98   :  { %153 = vmax.xlane.f32.xlu0 %v152_v10  ;;  %v155_v13 = vsel %vm151_vm2, %v150_v12, -inf }
  0xa0   :  { %156 = vmax.xlane.f32.xlu0 %v155_v13 }
 0x10b   :  { %v154_v14 = vpop.xlane.xlu0 %153 }
 0x10c   :  { %v158_v15 = vsub.f32 %v149_v9, %v154_v14 }
 0x10e   :  { %v160_v16 = vmul.f32 1.442695, %v158_v15 }
 0x110   :  { %303 = vpow2.f32 %v160_v16 }
 0x113   :  { %v157_v17 = vpop.xlane.xlu0 %156 }
 0x114   :  { %v159_v18 = vsub.f32 %v150_v12, %v157_v17 }
 0x116   :  { %v304_v19 = vpop.eup %303  ;;  %v162_v20 = vmul.f32 1.442695, %v159_v18 }
 0x117   :  { %v164_v21 = vsel %vm151_vm2, %v304_v19, 0.0 }
 0x118   :  { %305 = vpow2.f32 %v162_v20  ;;  %165 = vadd.xlane.f32.xlu1 %v164_v21 }
 0x11e   :  { %v306_v22 = vpop.eup %305 }
 0x11f   :  { %v167_v23 = vsel %vm151_vm2, %v306_v22, 0.0 }
 0x120   :  { %168 = vadd.xlane.f32.xlu1 %v167_v23 }
 0x18b   :  { %v166_v26 = vpop.xlane.xlu1 %165 }
 0x18c   :  { %307 = vrcp.f32 %v166_v26  ;;  %v181_v31 = vand.u32 2147483648, %v166_v26  ;;  %v179_v33 = vand.u32 2147483647, %v166_v26  ;;  %vm175_vm5 = vweird.f32 %v166_v26 }
 0x18e   :  { %v182_v36 = vor.u32 1.1754944e-38, %v181_v31  ;;  %vm180_vm7 = vcmp.eq.f32.partialorder %v179_v33, 8.507059e+37 }
 0x192   :  { %v308_v27 = vpop.eup %307 }
 0x193   :  { %v171_v28 = vmul.f32 %v308_v27, %v166_v26  ;;  %v169_v29 = vpop.xlane.xlu1 %168  ;;  %vm176_vm4 = vweird.f32 %v308_v27 }
 0x194   :  { %309 = vrcp.f32 %v169_v29  ;;  %vm177_vm6 = vmor %vm175_vm5, %vm176_vm4  ;;  %v195_v42 = vand.u32 2147483648, %v169_v29  ;;  %v193_v44 = vand.u32 2147483647, %v169_v29  ;;  %vm189_vm9 = vweird.f32 %v169_v29 }
 0x195   :  { %v172_v30 = vsub.f32 1.0, %v171_v28 }
 0x196   :  { %v196_v46 = vor.u32 1.1754944e-38, %v195_v42  ;;  %vm194_vm11 = vcmp.eq.f32.partialorder %v193_v44, 8.507059e+37 }
 0x197   :  { %v173_v32 = vmul.f32 %v308_v27, %v172_v30 }
 0x199   :  { %v174_v34 = vadd.f32 %v308_v27, %v173_v32 }
 0x19a   :  { %v310_v35 = vpop.eup %309 }
 0x19b   :  { %v185_v37 = vmul.f32 %v310_v35, %v169_v29  ;;  %v178_v38 = vsel %vm177_vm6, %v308_v27, %v174_v34  ;;  %vm190_vm8 = vweird.f32 %v310_v35 }
 0x19c   :  { %v183_v39 = vsel %vm180_vm7, %v182_v36, %v178_v38  ;;  %vm191_vm10 = vmor %vm189_vm9, %vm190_vm8 }
 0x19d   :  { %v186_v40 = vsub.f32 1.0, %v185_v37  ;;  %v198_v41 = vmul.f32 %v304_v19, %v183_v39 }
 0x19f   :  { %v187_v43 = vmul.f32 %v310_v35, %v186_v40  ;;  %293 = vmatmul.msk.f32.vlgmr.msra.gmra.mxu2 %vm151_vm2, %v198_v41  ;;  %246 = vst.msk [vmem:[#allocation11] sm:$0xff] %vm151_vm2, %v198_v41 }
 0x1a1   :  { %v188_v45 = vadd.f32 %v310_v35, %v187_v43 }
 0x1a3   :  { %v192_v47 = vsel %vm191_vm10, %v310_v35, %v188_v45 }
 0x1a4   :  { %v197_v48 = vsel %vm194_vm11, %v196_v46, %v192_v47 }
 0x1a5   :  { %v199_v49 = vmul.f32 %v306_v22, %v197_v48 }
 0x1a7   :  { %294 = vmatmul.msk.f32.vlgmr.msra.gmra.mxu3 %vm151_vm2, %v199_v49  ;;  %247 = vst.msk [vmem:[#allocation11 + $0x8] sm:$0xff] %vm151_vm2, %v199_v49 }
 0x1a8   :  { %275 = dma.vmem_to_hbm [thread:$0]  %s268_s12, 256, %s270_s15, [#allocation12], %s466_s26, %s466_s26, %s467_s27  }
 0x222   :  { %v220_v50 = vpop.f32.mrf.mxu2 }
 0x223   :  { %248 = vst.msk [vmem:[#allocation10] sm:$0xff] %vm92_vm0, %v220_v50 }
 0x22a   :  { %v243_v51 = vpop.f32.mrf.mxu3 }
 0x22b   :  { %249 = vst.msk [vmem:[#allocation10 + $0x8] sm:$0xff] %vm92_vm0, %v243_v51 }
 0x22c   :  { %262 = dma.vmem_to_hbm [thread:$0]  %s255_s17, 256, %s257_s20, [#allocation4], %s466_s26, %s466_s26, %s467_s27  }
 0x22d   :  { %461 = dma.done.wait [#allocation4], 256  }
 0x22e   :  { %462 = vsyncadd [#allocation4], 4294967040 }
 0x22f   :  { %463 = dma.done.wait [#allocation12], 256  }
 0x230   :  { %464 = vsyncadd [#allocation12], 4294967040 }
 0x231   :  { %284 = vsyncpa [#allocation3], 1 }
 0x232   :  { %285 = vsyncpa [#allocation6], 1 }
 0x233   :  { %286 = vsyncpa [#allocation9], 1 }
 0x234   :  { %287 = vsyncpa [#allocation4], 1 }
 0x235   :  { %288 = vsyncpa [#allocation12], 1 }

</bundles_post_ra>
